<compile_context>
chip_gen: v6e
topology: v6e:2x2x1
jax: 0.10.0
libtpu: 0.0.40
codegen_flags: <defaults>
</compile_context>

<pallas_src>
import functools

import jax
import jax.numpy as jnp
import numpy as np
from jax.experimental import pallas as pl
from jax.experimental.pallas import tpu as pltpu


def _wn_fused_kernel(x_ref, mask_ref, wcat_ref, bin_ref, wrs_ref, brs_ref,
                     o_ref, x_sc, o_sc, xs_sc,
                     *, K, C, T, pad, dilation, num_layers):
    """One grid step = (batch b, layer l).

    x_ref   : (1, C, T)       input residual stream (read once per b at l==0)
    mask_ref: (1, 1, T)
    wcat_ref: (1, 2C, K*C)    dilated-conv weight, taps concatenated on contraction
    bin_ref : (1, 2C, 1)      dilated-conv bias
    wrs_ref : (1, 2C, C)      1x1 res/skip weight (last layer: residual half zero)
    brs_ref : (1, 2C, 1)      1x1 res/skip bias
    o_ref   : (1, C, T)       skip output (written only at the last layer)
    x_sc    : (C, T) f32      residual stream, resident in VMEM across layers
    o_sc    : (C, T) f32      skip accumulator, resident in VMEM across layers
    xs_sc   : (K*C, T) f32    stacked shifted input for the single conv matmul
    """
    l = pl.program_id(1)

    @pl.when(l == 0)
    def _():
        x_sc[...] = x_ref[0].astype(jnp.float32)
        o_sc[...] = jnp.zeros_like(o_sc)
        # Halo columns of xs_sc are never overwritten by any layer (same static
        # tap offsets every layer), so zeroing once per batch is sufficient.
        xs_sc[...] = jnp.zeros_like(xs_sc)

    # ---- dilated conv as ONE MXU matmul: (2C, K*C) @ (K*C, T) --------------
    x32 = x_sc[...]
    for k in range(K):                          # K is small and static -> unrolled
        shift = k * dilation - pad              # input offset of tap k
        lo = max(0, -shift)                     # valid output columns [lo, hi)
        hi = min(T, T - shift)
        xs_sc[k * C:(k + 1) * C, lo:hi] = x32[:, lo + shift:hi + shift]

    wcat = wcat_ref[0].astype(jnp.float32)      # (2C, K*C)
    b_in = bin_ref[0].astype(jnp.float32)       # (2C, 1)
    acc = jnp.dot(wcat, xs_sc[...], preferred_element_type=jnp.float32) + b_in

    # gated activation (dropout p=0 -> identity)
    acts = jnp.tanh(acc[:C]) * jax.nn.sigmoid(acc[C:])          # (C, T)

    # 1x1 res/skip conv
    wrs = wrs_ref[0].astype(jnp.float32)        # (2C, C)
    b_rs = brs_ref[0].astype(jnp.float32)       # (2C, 1)
    z = jnp.dot(wrs, acts, preferred_element_type=jnp.float32) + b_rs   # (2C, T)

    m = mask_ref[0].astype(jnp.float32)         # (1, T)

    @pl.when(l < num_layers - 1)
    def _():
        x_sc[...] = (x_sc[...] + z[:C]) * m     # residual update (masked)
        o_sc[...] = o_sc[...] + z[C:]           # skip accumulate

    @pl.when(l == num_layers - 1)
    def _():
        # Last layer: only the skip half is real (residual half is zero-padded);
        # apply the final mask and write the single HBM output.
        o_ref[0] = ((o_sc[...] + z[C:]) * m).astype(o_ref.dtype)


def wavenet_forward(x, mask, stacked_params, *, kernel_size, dilation_rate, num_layers):
    B, C, T = x.shape
    pad = kernel_size // 2
    for i in range(num_layers):
        d = dilation_rate ** i
        # PyTorch uses padding=kernel_size//2 regardless of dilation; the original
        # forward is only shape-consistent when the conv output length equals T.
        assert T + 2 * pad - d * (kernel_size - 1) == T, \
            "use dilation_rate=1 (or kernel_size=1) so conv output length == T"
    # Under that constraint the tap offsets are identical for every layer
    # (kernel_size>1 forces dilation==1; kernel_size==1 has a single zero-offset
    # tap), so one static dilation value is exact.
    dilation = 1

    wcat_all, bin_all, wrs_all, brs_all = stacked_params
    K = kernel_size

    kern = functools.partial(_wn_fused_kernel, K=K, C=C, T=T, pad=pad,
                             dilation=dilation, num_layers=num_layers)

    return pl.pallas_call(
        kern,
        out_shape=jax.ShapeDtypeStruct((B, C, T), x.dtype),
        grid=(B, num_layers),
        in_specs=[
            pl.BlockSpec((1, C, T), lambda b, l: (b, 0, 0)),            # x (resident per b)
            pl.BlockSpec((1, 1, T), lambda b, l: (b, 0, 0)),            # mask (resident per b)
            pl.BlockSpec((1, 2 * C, K * C), lambda b, l: (l, 0, 0)),    # in-conv weight
            pl.BlockSpec((1, 2 * C, 1), lambda b, l: (l, 0, 0)),        # in-conv bias
            pl.BlockSpec((1, 2 * C, C), lambda b, l: (l, 0, 0)),        # res/skip weight
            pl.BlockSpec((1, 2 * C, 1), lambda b, l: (l, 0, 0)),        # res/skip bias
        ],
        out_specs=pl.BlockSpec((1, C, T), lambda b, l: (b, 0, 0)),      # skip output o
        scratch_shapes=[
            pltpu.VMEM((C, T), jnp.float32),        # residual stream
            pltpu.VMEM((C, T), jnp.float32),        # skip accumulator
            pltpu.VMEM((K * C, T), jnp.float32),    # stacked shifted conv input
        ],
        compiler_params=pltpu.CompilerParams(
            dimension_semantics=("parallel", "arbitrary")),
    )(x, mask, wcat_all, bin_all, wrs_all, brs_all)


# ----------------------- parameter setup (plain JAX glue) -----------------------

def init_params(key, channels, kernel_size, num_layers):
    """Deterministic init.  weight_norm(w): w_eff = g * v / ||v||, with g initialized
    to ||v|| (per output channel) exactly as PyTorch's weight_norm does at wrap time."""
    C = channels
    params = []
    for i in range(num_layers):
        key, k1, k2, k3, k4 = jax.random.split(key, 5)
        v = jax.random.normal(k1, (2 * C, C, kernel_size), jnp.float32) * 0.1
        g = jnp.sqrt(jnp.sum(v * v, axis=(1, 2), keepdims=True))
        w_in = g * v / jnp.sqrt(jnp.sum(v * v, axis=(1, 2), keepdims=True))
        b_in = jax.random.normal(k2, (2 * C,), jnp.float32) * 0.1

        rs_out = C if i == num_layers - 1 else 2 * C
        v2 = jax.random.normal(k3, (rs_out, C, 1), jnp.float32) * 0.1
        g2 = jnp.sqrt(jnp.sum(v2 * v2, axis=(1, 2), keepdims=True))
        w_rs = (g2 * v2 / jnp.sqrt(jnp.sum(v2 * v2, axis=(1, 2), keepdims=True)))[:, :, 0]
        b_rs = jax.random.normal(k4, (rs_out,), jnp.float32) * 0.1
        params.append((w_in, b_in, w_rs, b_rs))
    return params


def prep_params(params, channels, kernel_size):
    """Stack per-layer weights for the fused kernel.

    - in-conv weight (2C, C, K) -> (2C, K*C) with taps concatenated along the
      contraction dim (matches the stacked shifted-input layout in the kernel).
    - last layer's res/skip (C, C) is zero-padded on the residual half to (2C, C)
      so every layer shares the same stacked shape (the wasted half-matmul is
      negligible at these channel counts; its result is never used or written).
    """
    C = channels
    K = kernel_size
    N = len(params)
    wcats, bins, wrss, brss = [], [], [], []
    for i, (w_in, b_in, w_rs, b_rs) in enumerate(params):
        wcat = jnp.transpose(w_in, (0, 2, 1)).reshape(2 * C, K * C)   # (2C, K*C)
        if i == N - 1:
            w_rs = jnp.concatenate([jnp.zeros((C, C), w_rs.dtype), w_rs], axis=0)
            b_rs = jnp.concatenate([jnp.zeros((C,), b_rs.dtype), b_rs], axis=0)
        wcats.append(wcat)
        bins.append(b_in[:, None])
        wrss.append(w_rs)
        brss.append(b_rs[:, None])
    return (jnp.stack(wcats), jnp.stack(bins), jnp.stack(wrss), jnp.stack(brss))


# ----------------------------- pure-JAX reference -----------------------------

def ref_forward(x, mask, params, *, kernel_size, dilation_rate, num_layers, channels):
    C = channels
    o = jnp.zeros_like(x)
    for i, (w_in, b_in, w_rs, b_rs) in enumerate(params):
        dilation = dilation_rate ** i
        x_in = jax.lax.conv_general_dilated(
            x, w_in, window_strides=(1,), padding=[(kernel_size // 2,) * 2],
            rhs_dilation=(dilation,), dimension_numbers=('NCH', 'OIH', 'NCH')
        ) + b_in[None, :, None]
        x1, x2 = x_in[:, :C], x_in[:, C:]
        acts = jnp.tanh(x1) * jax.nn.sigmoid(x2)
        x_acts = jax.lax.conv_general_dilated(
            acts, w_rs[:, :, None], window_strides=(1,), padding=[(0, 0)],
            dimension_numbers=('NCH', 'OIH', 'NCH')
        ) + b_rs[None, :, None]
        if i == num_layers - 1:
            o = o + x_acts
        else:
            r, s = x_acts[:, :C], x_acts[:, C:]
            x = (x + r) * mask
            o = o + s
    return o * mask


if __name__ == "__main__":
    B, C, T = 2, 8, 128
    kernel_size, dilation_rate, num_layers = 3, 1, 4

    key = jax.random.PRNGKey(0)
    kx, kp = jax.random.split(key, 2)
    x = jax.random.normal(kx, (B, C, T), jnp.float32)
    lengths = jnp.array([T, T // 2])
    mask = (jnp.arange(T)[None, :] < lengths[:, None]).astype(jnp.float32)[:, None, :]  # (B,1,T)

    params = init_params(kp, C, kernel_size, num_layers)
    stacked = prep_params(params, C, kernel_size)

    out = wavenet_forward(x, mask, stacked, kernel_size=kernel_size,
                          dilation_rate=dilation_rate, num_layers=num_layers)
    out = jax.block_until_ready(out)

    ref = ref_forward(x, mask, params, kernel_size=kernel_size,
                      dilation_rate=dilation_rate, num_layers=num_layers, channels=C)
    np.testing.assert_allclose(np.asarray(out), np.asarray(ref), rtol=1e-5, atol=1e-5)
    print("KERNEL_OK")
</pallas_src>

<mosaic_0001>
module attributes {stable_mosaic.version = 11 : i64} {
  func.func @_wn_fused_kernel(%arg0: i32, %arg1: i32, %arg2: memref<1x8x128xf32, #tpu.memory_space<vmem>>, %arg3: memref<1x1x128xf32, #tpu.memory_space<vmem>>, %arg4: memref<1x16x24xf32, #tpu.memory_space<vmem>>, %arg5: memref<1x16x1xf32, #tpu.memory_space<vmem>>, %arg6: memref<1x16x8xf32, #tpu.memory_space<vmem>>, %arg7: memref<1x16x1xf32, #tpu.memory_space<vmem>>, %arg8: memref<1x8x128xf32, #tpu.memory_space<vmem>>, %arg9: memref<8x128xf32, #tpu.memory_space<vmem>>, %arg10: memref<8x128xf32, #tpu.memory_space<vmem>>, %arg11: memref<24x128xf32, #tpu.memory_space<vmem>>) attributes {dimension_semantics = [#tpu.dimension_semantics<parallel>, #tpu.dimension_semantics<arbitrary>], iteration_bounds = array<i64: 2, 4>, scalar_prefetch = 0 : i64, scratch_operands = 3 : i64, tpu.core_type = #tpu.core_type<tc>, window_params = [{transform_indices = @transform_0, window_bounds = array<i64: 1, 8, 128>}, {transform_indices = @transform_1, window_bounds = array<i64: 1, 1, 128>}, {transform_indices = @transform_2, window_bounds = array<i64: 1, 16, 24>}, {transform_indices = @transform_3, window_bounds = array<i64: 1, 16, 1>}, {transform_indices = @transform_4, window_bounds = array<i64: 1, 16, 8>}, {transform_indices = @transform_5, window_bounds = array<i64: 1, 16, 1>}, {transform_indices = @transform_6, window_bounds = array<i64: 1, 8, 128>}]} {
    %c0_i32 = arith.constant 0 : i32
    %0 = arith.cmpi eq, %arg1, %c0_i32 : i32
    %1 = arith.extui %0 : i1 to i32
    %c0_i32_0 = arith.constant 0 : i32
    %2 = arith.cmpi ne, %1, %c0_i32_0 : i32
    scf.if %2 {
      %c0_27 = arith.constant 0 : index
      %c0_28 = arith.constant 0 : index
      %c0_29 = arith.constant 0 : index
      %41 = vector.load %arg2[%c0_27, %c0_28, %c0_29] : memref<1x8x128xf32, #tpu.memory_space<vmem>>, vector<1x8x128xf32>
      %42 = vector.shape_cast %41 : vector<1x8x128xf32> to vector<8x128xf32>
      %c0_30 = arith.constant 0 : index
      %c0_31 = arith.constant 0 : index
      %43 = vector.load %arg9[%c0_30, %c0_31] : memref<8x128xf32, #tpu.memory_space<vmem>>, vector<8x128xf32>
      tpu.vector_store %arg9[%c0_30, %c0_31], %42 {strides = array<i32>} : memref<8x128xf32, #tpu.memory_space<vmem>>, vector<8x128xf32>,
      %cst_32 = arith.constant 0.000000e+00 : f32
      %44 = vector.broadcast %cst_32 : f32 to vector<8x128xf32>
      %c0_33 = arith.constant 0 : index
      %c0_34 = arith.constant 0 : index
      %45 = vector.load %arg10[%c0_33, %c0_34] : memref<8x128xf32, #tpu.memory_space<vmem>>, vector<8x128xf32>
      tpu.vector_store %arg10[%c0_33, %c0_34], %44 {strides = array<i32>} : memref<8x128xf32, #tpu.memory_space<vmem>>, vector<8x128xf32>,
      %cst_35 = arith.constant 0.000000e+00 : f32
      %46 = vector.broadcast %cst_35 : f32 to vector<24x128xf32>
      %c0_36 = arith.constant 0 : index
      %c0_37 = arith.constant 0 : index
      %47 = vector.load %arg11[%c0_36, %c0_37] : memref<24x128xf32, #tpu.memory_space<vmem>>, vector<24x128xf32>
      tpu.vector_store %arg11[%c0_36, %c0_37], %46 {strides = array<i32>} : memref<24x128xf32, #tpu.memory_space<vmem>>, vector<24x128xf32>,
    } else {
    }
    %c0 = arith.constant 0 : index
    %c0_1 = arith.constant 0 : index
    %3 = vector.load %arg9[%c0, %c0_1] : memref<8x128xf32, #tpu.memory_space<vmem>>, vector<8x128xf32>
    %4 = vector.extract_strided_slice %3 {offsets = [0, 0], sizes = [8, 127], strides = [1, 1]} : vector<8x128xf32> to vector<8x127xf32>
    %c0_2 = arith.constant 0 : index
    %c1 = arith.constant 1 : index
    %5 = vector.load %arg11[%c0_2, %c1] : memref<24x128xf32, #tpu.memory_space<vmem>>, vector<8x127xf32>
    tpu.vector_store %arg11[%c0_2, %c1], %4 {strides = array<i32>} : memref<24x128xf32, #tpu.memory_space<vmem>>, vector<8x127xf32>,
    %c8 = arith.constant 8 : index
    %c0_3 = arith.constant 0 : index
    %6 = vector.load %arg11[%c8, %c0_3] : memref<24x128xf32, #tpu.memory_space<vmem>>, vector<8x128xf32>
    tpu.vector_store %arg11[%c8, %c0_3], %3 {strides = array<i32>} : memref<24x128xf32, #tpu.memory_space<vmem>>, vector<8x128xf32>,
    %7 = vector.extract_strided_slice %3 {offsets = [0, 1], sizes = [8, 127], strides = [1, 1]} : vector<8x128xf32> to vector<8x127xf32>
    %c16 = arith.constant 16 : index
    %c0_4 = arith.constant 0 : index
    %8 = vector.load %arg11[%c16, %c0_4] : memref<24x128xf32, #tpu.memory_space<vmem>>, vector<8x127xf32>
    tpu.vector_store %arg11[%c16, %c0_4], %7 {strides = array<i32>} : memref<24x128xf32, #tpu.memory_space<vmem>>, vector<8x127xf32>,
    %c0_5 = arith.constant 0 : index
    %c0_6 = arith.constant 0 : index
    %c0_7 = arith.constant 0 : index
    %9 = vector.load %arg4[%c0_5, %c0_6, %c0_7] : memref<1x16x24xf32, #tpu.memory_space<vmem>>, vector<1x16x24xf32>
    %10 = vector.shape_cast %9 : vector<1x16x24xf32> to vector<16x24xf32>
    %c0_8 = arith.constant 0 : index
    %c0_9 = arith.constant 0 : index
    %c0_10 = arith.constant 0 : index
    %11 = vector.load %arg5[%c0_8, %c0_9, %c0_10] : memref<1x16x1xf32, #tpu.memory_space<vmem>>, vector<1x16x1xf32>
    %12 = vector.shape_cast %11 : vector<1x16x1xf32> to vector<16x1xf32>
    %c0_11 = arith.constant 0 : index
    %c0_12 = arith.constant 0 : index
    %13 = vector.load %arg11[%c0_11, %c0_12] : memref<24x128xf32, #tpu.memory_space<vmem>>, vector<24x128xf32>
    %cst = arith.constant dense<0.000000e+00> : vector<16x128xf32>
    %14 = tpu.matmul %10, %13, %cst {dimension_numbers = #tpu.dot_dimension_numbers<[1], [0], [0], [1], [0, 0, 1, 1], [], []>} : vector<16x24xf32>, vector<24x128xf32>, vector<16x128xf32> -> vector<16x128xf32>
    %15 = vector.broadcast %12 : vector<16x1xf32> to vector<16x128xf32>
    %16 = arith.addf %14, %15 : vector<16x128xf32>
    %17 = vector.extract_strided_slice %16 {offsets = [0, 0], sizes = [8, 128], strides = [1, 1]} : vector<16x128xf32> to vector<8x128xf32>
    %18 = math.tanh %17 : vector<8x128xf32>
    %19 = vector.extract_strided_slice %16 {offsets = [8, 0], sizes = [8, 128], strides = [1, 1]} : vector<16x128xf32> to vector<8x128xf32>
    %20 = arith.negf %19 : vector<8x128xf32>
    %21 = math.exp %20 : vector<8x128xf32>
    %cst_13 = arith.constant 1.000000e+00 : f32
    %22 = vector.broadcast %cst_13 : f32 to vector<8x128xf32>
    %23 = arith.addf %22, %21 : vector<8x128xf32>
    %24 = arith.divf %22, %23 : vector<8x128xf32>
    %25 = arith.mulf %18, %24 : vector<8x128xf32>
    %c0_14 = arith.constant 0 : index
    %c0_15 = arith.constant 0 : index
    %c0_16 = arith.constant 0 : index
    %26 = vector.load %arg6[%c0_14, %c0_15, %c0_16] : memref<1x16x8xf32, #tpu.memory_space<vmem>>, vector<1x16x8xf32>
    %27 = vector.shape_cast %26 : vector<1x16x8xf32> to vector<16x8xf32>
    %c0_17 = arith.constant 0 : index
    %c0_18 = arith.constant 0 : index
    %c0_19 = arith.constant 0 : index
    %28 = vector.load %arg7[%c0_17, %c0_18, %c0_19] : memref<1x16x1xf32, #tpu.memory_space<vmem>>, vector<1x16x1xf32>
    %29 = vector.shape_cast %28 : vector<1x16x1xf32> to vector<16x1xf32>
    %cst_20 = arith.constant dense<0.000000e+00> : vector<16x128xf32>
    %30 = tpu.matmul %27, %25, %cst_20 {dimension_numbers = #tpu.dot_dimension_numbers<[1], [0], [0], [1], [0, 0, 1, 1], [], []>} : vector<16x8xf32>, vector<8x128xf32>, vector<16x128xf32> -> vector<16x128xf32>
    %31 = vector.broadcast %29 : vector<16x1xf32> to vector<16x128xf32>
    %32 = arith.addf %30, %31 : vector<16x128xf32>
    %c0_21 = arith.constant 0 : index
    %c0_22 = arith.constant 0 : index
    %c0_23 = arith.constant 0 : index
    %33 = vector.load %arg3[%c0_21, %c0_22, %c0_23] : memref<1x1x128xf32, #tpu.memory_space<vmem>>, vector<1x1x128xf32>
    %34 = vector.shape_cast %33 : vector<1x1x128xf32> to vector<1x128xf32>
    %c3_i32 = arith.constant 3 : i32
    %35 = arith.cmpi slt, %arg1, %c3_i32 : i32
    %36 = arith.extui %35 : i1 to i32
    %c0_i32_24 = arith.constant 0 : i32
    %37 = arith.cmpi ne, %36, %c0_i32_24 : i32
    scf.if %37 {
      %c0_27 = arith.constant 0 : index
      %c0_28 = arith.constant 0 : index
      %41 = vector.load %arg9[%c0_27, %c0_28] : memref<8x128xf32, #tpu.memory_space<vmem>>, vector<8x128xf32>
      %42 = vector.extract_strided_slice %32 {offsets = [0, 0], sizes = [8, 128], strides = [1, 1]} : vector<16x128xf32> to vector<8x128xf32>
      %43 = arith.addf %41, %42 : vector<8x128xf32>
      %44 = vector.broadcast %34 : vector<1x128xf32> to vector<8x128xf32>
      %45 = arith.mulf %43, %44 : vector<8x128xf32>
      %c0_29 = arith.constant 0 : index
      %c0_30 = arith.constant 0 : index
      %46 = vector.load %arg9[%c0_29, %c0_30] : memref<8x128xf32, #tpu.memory_space<vmem>>, vector<8x128xf32>
      tpu.vector_store %arg9[%c0_29, %c0_30], %45 {strides = array<i32>} : memref<8x128xf32, #tpu.memory_space<vmem>>, vector<8x128xf32>,
      %c0_31 = arith.constant 0 : index
      %c0_32 = arith.constant 0 : index
      %47 = vector.load %arg10[%c0_31, %c0_32] : memref<8x128xf32, #tpu.memory_space<vmem>>, vector<8x128xf32>
      %48 = vector.extract_strided_slice %32 {offsets = [8, 0], sizes = [8, 128], strides = [1, 1]} : vector<16x128xf32> to vector<8x128xf32>
      %49 = arith.addf %47, %48 : vector<8x128xf32>
      %c0_33 = arith.constant 0 : index
      %c0_34 = arith.constant 0 : index
      %50 = vector.load %arg10[%c0_33, %c0_34] : memref<8x128xf32, #tpu.memory_space<vmem>>, vector<8x128xf32>
      tpu.vector_store %arg10[%c0_33, %c0_34], %49 {strides = array<i32>} : memref<8x128xf32, #tpu.memory_space<vmem>>, vector<8x128xf32>,
    } else {
    }
    %c3_i32_25 = arith.constant 3 : i32
    %38 = arith.cmpi eq, %arg1, %c3_i32_25 : i32
    %39 = arith.extui %38 : i1 to i32
    %c0_i32_26 = arith.constant 0 : i32
    %40 = arith.cmpi ne, %39, %c0_i32_26 : i32
    scf.if %40 {
      %c0_27 = arith.constant 0 : index
      %c0_28 = arith.constant 0 : index
      %41 = vector.load %arg10[%c0_27, %c0_28] : memref<8x128xf32, #tpu.memory_space<vmem>>, vector<8x128xf32>
      %42 = vector.extract_strided_slice %32 {offsets = [8, 0], sizes = [8, 128], strides = [1, 1]} : vector<16x128xf32> to vector<8x128xf32>
      %43 = arith.addf %41, %42 : vector<8x128xf32>
      %44 = vector.broadcast %34 : vector<1x128xf32> to vector<8x128xf32>
      %45 = arith.mulf %43, %44 : vector<8x128xf32>
      %c0_29 = arith.constant 0 : index
      %c0_30 = arith.constant 0 : index
      %c0_31 = arith.constant 0 : index
      %46 = vector.load %arg8[%c0_29, %c0_30, %c0_31] : memref<1x8x128xf32, #tpu.memory_space<vmem>>, vector<1x8x128xf32>
      %47 = vector.shape_cast %46 : vector<1x8x128xf32> to vector<8x128xf32>
      %48 = vector.shape_cast %45 : vector<8x128xf32> to vector<1x8x128xf32>
      tpu.vector_store %arg8[%c0_29, %c0_30, %c0_31], %48 {strides = array<i32>} : memref<1x8x128xf32, #tpu.memory_space<vmem>>, vector<1x8x128xf32>,
    } else {
    }
    return
  }
  func.func @transform_0(%arg0: i32, %arg1: i32) -> (i32, i32, i32) {
    %c0_i32 = arith.constant 0 : i32
    %c0_i32_0 = arith.constant 0 : i32
    %c0_i32_1 = arith.constant 0 : i32
    return %arg0, %c0_i32, %c0_i32_0 : i32, i32, i32
  }
  func.func @transform_1(%arg0: i32, %arg1: i32) -> (i32, i32, i32) {
    %c0_i32 = arith.constant 0 : i32
    %c0_i32_0 = arith.constant 0 : i32
    %c0_i32_1 = arith.constant 0 : i32
    return %arg0, %c0_i32, %c0_i32_0 : i32, i32, i32
  }
  func.func @transform_2(%arg0: i32, %arg1: i32) -> (i32, i32, i32) {
    %c0_i32 = arith.constant 0 : i32
    %c0_i32_0 = arith.constant 0 : i32
    %c0_i32_1 = arith.constant 0 : i32
    return %arg1, %c0_i32, %c0_i32_0 : i32, i32, i32
  }
  func.func @transform_3(%arg0: i32, %arg1: i32) -> (i32, i32, i32) {
    %c0_i32 = arith.constant 0 : i32
    %c0_i32_0 = arith.constant 0 : i32
    %c0_i32_1 = arith.constant 0 : i32
    return %arg1, %c0_i32, %c0_i32_0 : i32, i32, i32
  }
  func.func @transform_4(%arg0: i32, %arg1: i32) -> (i32, i32, i32) {
    %c0_i32 = arith.constant 0 : i32
    %c0_i32_0 = arith.constant 0 : i32
    %c0_i32_1 = arith.constant 0 : i32
    return %arg1, %c0_i32, %c0_i32_0 : i32, i32, i32
  }
  func.func @transform_5(%arg0: i32, %arg1: i32) -> (i32, i32, i32) {
    %c0_i32 = arith.constant 0 : i32
    %c0_i32_0 = arith.constant 0 : i32
    %c0_i32_1 = arith.constant 0 : i32
    return %arg1, %c0_i32, %c0_i32_0 : i32, i32, i32
  }
  func.func @transform_6(%arg0: i32, %arg1: i32) -> (i32, i32, i32) {
    %c0_i32 = arith.constant 0 : i32
    %c0_i32_0 = arith.constant 0 : i32
    %c0_i32_1 = arith.constant 0 : i32
    return %arg0, %c0_i32, %c0_i32_0 : i32, i32, i32
  }
}

</mosaic_0001>

<bundles_post_ra>
// kernel: tpu_custom_call.1
= control target key start
LH: loop header
LB: loop body
LE: loop exit
PB: predicated region body
PF: predicated region fallthrough
CT: control target
= control target key end

     0   :  { %11 = vsyncpa [#allocation6], 0  ;;  %s1197_s0 = inlined_call_operand.vmem [shape: f32[2,8,128], index: 0, kind: input, shape index: {}]   ;;  %s1198_s1 = inlined_call_operand.vmem [shape: f32[2,1,128], index: 1, kind: input, shape index: {}]   ;;  %s1199_s2 = inlined_call_operand.vmem [shape: f32[4,16,24], index: 2, kind: input, shape index: {}]   ;;  %s1200_s3 = inlined_call_operand.vmem [shape: f32[4,16,1], index: 3, kind: input, shape index: {}]   ;;  %s1201_s4 = inlined_call_operand.vmem [shape: f32[4,16,8], index: 4, kind: input, shape index: {}]   ;;  %s1202_s5 = inlined_call_operand.vmem [shape: f32[4,16,1], index: 5, kind: input, shape index: {}]   ;;  %s1203_s6 = inlined_call_operand.hbm [shape: f32[2,8,128], index: 6, kind: output, shape index: {}]  }
   0x1   :  { %13 = vsyncpa [#allocation6 + $0x1], 0  ;;  %s1022_s21 = smov 0   ;;  %s1024_s22 = smov 0  }
   0x2   :  { %s1026_s23 = smov 0   ;;  %s1028_s24 = smov 0  }
   0x3   :  { %s1030_s25 = smov 0   ;;  %s1032_s26 = smov 0  }
   0x4   :  { %s1034_s27 = smov 0   ;;  %s1036_s28 = smov 0  }
   0x5 LB: > { %1213 = sst [smem:[#allocation8_spill]] %s952_s21  ;;  %s752_s29 = sadd.s32 4294967295, %s980_s28   ;;  %s980_s28 = sphi %s1036_s28, %s19_s28   ;;  %s976_s27 = sphi %s1034_s27, %s1233_s27   ;;  %s972_s26 = sphi %s1032_s26, %s1232_s26   ;;  %s968_s25 = sphi %s1030_s25, %s1231_s25   ;;  %s964_s24 = sphi %s1028_s24, %s1230_s24   ;;  %s960_s23 = sphi %s1026_s23, %s1229_s23   ;;  %s956_s22 = sphi %s1024_s22, %s1235_s22   ;;  %s952_s21 = sphi %s1022_s21, %s1234_s21  }
   0x6   : > { %1214 = sst [smem:[#allocation9_spill]] %s960_s23  ;;  %s753_s30 = sadd.s32 4294967294, %s980_s28  }
   0x7   : > { %1215 = sst [smem:[#allocation10_spill]] %s972_s26  ;;  %s28_s7 = sadd.s32 1, %s972_s26 }
   0x8   : > { %1216 = sst [smem:[#allocation11_spill]] %s976_s27  ;;  %p29_p0 = scmp.ge.s32.totalorder %s28_s7, 4 }
   0x9   : > { %1217 = sst [smem:[#allocation12_spill]] %s980_s28  ;;  %s31_s8 = sadd.s32 1, %s976_s27 }
   0xa   : > { %p204_p1 = scmp.ne.s32.totalorder %s960_s23, %s956_s22  ;;  %p205_p2 = scmp.eq.s32.totalorder %s752_s29, 7 }
   0xb   : > { %s1237_s7 = smov (%p29_p0, %s28_s7), 0  ;;  %s1239_s8 = smov (!%p29_p0, %s31_s8), %s976_s27 }
   0xc   : > { %1218 = sst [smem:[#allocation13_spill]] %s1237_s7  ;;  %p1071_p3 = por %p205_p2, %p204_p1 }
   0xd   : > { %p210_p4 = scmp.ne.s32.totalorder %s956_s22, %s952_s21  ;;  %p33_p5 = scmp.ge.s32.totalorder %s1239_s8, 2 }
   0xe   : > { %p211_p6 = scmp.eq.s32.totalorder %s753_s30, 7  ;;  %p756_p7 = scmp.ge.s32.totalorder %s980_s28, 1 }
   0xf   : > { %p274_p8 = scmp.lt.s32.totalorder %s980_s28, 9  ;;  %s1241_s8 = smov (%p33_p5, %s1239_s8), 0 }
  0x10   : > { %1220 = sst [smem:[#allocation14_spill]] %s1241_s8  ;;  %p1081_p9 = por %p211_p6, %p210_p4 }
  0x11   : > { %p275_p10 = pnand %p756_p7, %p274_p8  ;;  %s191_s11 = ssub.s32 %s976_s27, %s1241_s8 }
  0x12   : > { %s1221_s10 = scalar_select %p1081_p9, 1, 0 }
  0x13   : > { %s194_s12 = sadd.s32 1, %s960_s23  ;;  %p192_p11 = scmp.eq.s32.totalorder %s191_s11, 0 }
  0x14   : > { %1222 = sst [smem:[#allocation15_spill]] %s1221_s10  ;;  %278 = sbr.rel (%p275_p10) target bundleno = 654 (0x28e), region = 44 }
  0x15   : > { %s1089_s13 = scalar_select %p192_p11, %s960_s23, %s194_s12  }
  0x16   : > { %s1205_s14 = sand.u32 (!%p275_p10), 1, %s956_s22   ;;  %p326_p12 = scmp.lt.s32.totalorder (!%p275_p10), %s968_s25, 1 }
  0x17   : > { %1223 = sst [smem:[#allocation16_spill]] %s1089_s13  ;;  %s1095_s15 = sshll.u32 (!%p275_p10), %s1205_s14, 3 }
  0x18   : > { %p333_p13 = scmp.lt.s32.totalorder (!%p275_p10), %s964_s24, 3  ;;  %p767_p0 = scmp.ne.s32.totalorder (!%p275_p10), %s964_s24, 0 }
  0x19   : > { %s1099_s16 = scalar_select %p326_p12, %s968_s25, 1 }
  0x1a   : > { %s334_s17 = scalar_select %p333_p13, %s964_s24, 3 }
  0x1b   : > { %s758_s18 = sshll.u32 %s1099_s16, 3  ;;  %s332_s29 = scalar_lea.vmem %s1198_s1, %s1099_s16 }
  0x1c   : > { %s329_s12 = scalar_lea.vmem %s1197_s0, %s758_s18  ;;  %s779_s8 = sshll.u32 %s334_s17, 4 }
  0x1d   : > { %s1113_s27 = scalar_lea.vmem %s1199_s2, %s779_s8  ;;  %s342_s23 = scalar_lea.vmem %s1200_s3, %s779_s8 }
  0x1e   : > { %s1121_s28 = scalar_lea.vmem %s1201_s4, %s779_s8  ;;  %s1126_s30 = scalar_lea.vmem %s1202_s5, %s779_s8 }
  0x1f   : > { %s325_s17 = scalar_lea.vmem [#allocation5], %s1095_s15  ;;  %356 = sbr.rel (%p767_p0) target bundleno = 39 (0x27), region = 48 }
  0x24   : > { %v357_v0 = vld [vmem:[%s329_s12] sm:$0xff]  ;;  %v982_v1 = vmov 0.0  }
  0x25   : > { %358 = vst [vmem:[#allocation2] sm:$0xff] %v357_v0  ;;  %359 = vst [vmem:[#allocation3] sm:$0xff] %v982_v1 }
  0x26   : > { %360 = vst [vmem:[#allocation4] sm:$0xff] %v982_v1  ;;  %362 = vst [vmem:[#allocation4 + $0x10] sm:$0xff] %v982_v1 }
  0x27 PF: > { %v376_v3 = vld [vmem:[%s1113_s27] sm:$0xff]  ;;  %s983_s21 = smov 127   ;;  %vm393_vm0 = vcmask 195584   ;;  %v379_v4 = vld [vmem:[%s342_s23 + $0x8] sm:$0xff]  ;;  %v984_v5 = vmov 0   ;;  %s985_s26 = smov 1  }
  0x28   : > { %797 = vmatprep.mubr.msk.f32.mxu0 %vm393_vm0, %v376_v3  ;;  %880 = vset.pattern.permute.xlu1 %v984_v5  ;;  %v378_v6 = vld [vmem:[%s342_s23] sm:$0xff]  ;;  %v486_v7 = vld [vmem:[%s1126_s30 + $0x8] sm:$0xff]  ;;  %vm374_vm1 = vcmask 1039360   ;;  %vm368_vm2 = vcmask 1047560   ;;  %vm497_vm3 = vcmask 64512   ;;  %p773_p1 = scmp.ge.s32.totalorder %s964_s24, 3 }
  0x29   : > { %881 = vset.pattern.permute.xlu0 %v984_v5  ;;  %390 = vperm.xlu1 %880, %v379_v4   ;;  %v377_v12 = vld [vmem:[%s1113_s27 + $0x8] sm:$0xff]  ;;  %v483_v13 = vld [vmem:[%s1121_s28] sm:$0xff] }
  0x2a   : > { %802 = vmatprep.mubr.msk.f32.mxu1 %vm497_vm3, %v483_v13  ;;  %v485_v14 = vld [vmem:[%s1126_s30] sm:$0xff]  ;;  %v484_v27 = vld [vmem:[%s1121_s28 + $0x8] sm:$0xff] }
  0x2b   : > { %v579_v28 = vld [vmem:[%s332_s29] sm:$0x1] }
  0x2c   : > { %v363_v2 = vld [vmem:[#allocation2] sm:$0xff] }
  0x2d   : > { %371 = vrot.lane.b32.xlu0 %v363_v2, %s983_s21  ;;  %385 = vperm.xlu1 %880, %v378_v6  }
  0x31   : > { %365 = vrot.lane.b32.xlu0 %v363_v2, %s985_s26  ;;  %494 = vperm.xlu1 %880, %v486_v7  }
  0x35   : > { %489 = vperm.xlu0 %881, %v485_v14  }
  0x9f   : > { %v372_v8 = vpop.permute.xlu0 %371 }
  0xa0   : > { %375 = vst.msk [vmem:[#allocation4 + $0x10] sm:$0xff] %vm374_vm1, %v372_v8 }
  0xa3   : > { %v366_v9 = vpop.permute.xlu0 %365 }
  0xa4   : > { %369 = vst.msk [vmem:[#allocation4] sm:$0xff] %vm368_vm2, %v366_v9  ;;  %v391_v15 = vpop.permute.xlu1 %390 }
  0xa7   : > { %v382_v10 = vld [vmem:[#allocation4 + $0x10] sm:$0xff] }
  0xa8   : > { %791 = vmatprep.subr.mxu0 %v382_v10  ;;  %v386_v20 = vpop.permute.xlu1 %385 }
  0xa9   : > { %792 = vmatpush3.msra.mxu0 %v382_v10 }
  0xaa   : > { %793 = vmatprep.subr.mxu0 %v363_v2 }
  0xab   : > { %794 = vmatpush3.msra.mxu0 %v363_v2  ;;  %v380_v11 = vld [vmem:[#allocation4] sm:$0xff] }
  0xac   : > { %795 = vmatprep.subr.mxu0 %v380_v11  ;;  %v495_v29 = vpop.permute.xlu1 %494 }
  0xad   : > { %796 = vmatpush3.msra.mxu0 %v380_v11 }
  0xae   : > { %798 = vmatmul.mubr.msk.f32.vlgmr.msra.gmra.mxu0 %vm393_vm0, %v377_v12 }
  0xb0   : > { %v490_v31 = vpop.permute.xlu0 %489 }
 0x16e   : > { %v799_v16 = vpop.f32.mrf.mxu0 }
 0x16f   : > { %v472_v17 = vadd.f32 %v799_v16, %v391_v15 }
 0x170   : > { %v466_v19 = vpop.f32.mrf.mxu0 }
 0x171   : > { %v770_v18 = vmul.f32 -1.442695, %v472_v17  ;;  %v467_v21 = vadd.f32 %v466_v19, %v386_v20 }
 0x173   : > { %882 = vpow2.f32 %v770_v18 }
 0x174   : > { %884 = vtanh.f32 %v467_v21 }
 0x180   : > { %v883_v22 = vpop.eup %882 }
 0x181   : > { %v479_v23 = vadd.f32 1.0, %v883_v22  ;;  %v885_v24 = vpop.eup %884 }
 0x183   : > { %886 = vrcp.f32 %v479_v23 }
 0x190   : > { %v887_v25 = vpop.eup %886 }
 0x191   : > { %v482_v26 = vmul.f32 %v887_v25, %v885_v24 }
 0x193   : > { %800 = vmatprep.subr.mxu1 %v482_v26 }
 0x194   : > { %801 = vmatpush3.msra.mxu1 %v482_v26 }
 0x195   : > { %803 = vmatmul.mubr.msk.f32.vlgmr.msra.gmra.mxu1 %vm497_vm3, %v484_v27 }
 0x254   : > { %583 = sbr.rel (%p773_p1) target bundleno = 612 (0x264), region = 52 }
 0x255   : > { %v804_v30 = vpop.f32.mrf.mxu1 }
 0x256   : > { %v576_v32 = vadd.f32 %v804_v30, %v495_v29 }
 0x257   : > { %v570_v33 = vpop.f32.mrf.mxu1 }
 0x258   : > { %v571_v34 = vadd.f32 %v570_v33, %v490_v31 }
 0x259   : > { %v587_v35 = vlaneseq  ;;  %v594_v36 = vld [vmem:[#allocation3] sm:$0xff]  ;;  %v584_v37 = vld [vmem:[#allocation2] sm:$0xff] }
 0x25a   : > { %v595_v38 = vadd.f32 %v594_v36, %v576_v32  ;;  %v585_v40 = vadd.f32 %v584_v37, %v571_v34 }
 0x25b   : > { %v588_v39 = vshrl.u32 %v587_v35, 7 }
 0x25c   : > { %596 = vst [vmem:[#allocation3] sm:$0xff] %v595_v38 }
 0x25d   : > { %v589_v41 = vsub.s32 0, %v588_v39 }
 0x25f   : > { %v590_v42 = vrot.slane %v579_v28, %v589_v41 }
 0x261   : > { %v592_v43 = vmul.f32 %v590_v42, %v585_v40 }
 0x263   : > { %593 = vst [vmem:[#allocation2] sm:$0xff] %v592_v43 }
 0x264 PF: > { %p774_p2 = scmp.ne.s32.totalorder %s964_s24, 3 }
 0x266   : > { %600 = sbr.rel (%p774_p2) target bundleno = 630 (0x276), region = 56 }
 0x26b   : > { %v604_v44 = vlaneseq  ;;  %v601_v45 = vld [vmem:[#allocation3] sm:$0xff] }
 0x26c   : > { %v602_v47 = vadd.f32 %v601_v45, %v576_v32 }
 0x26d   : > { %v605_v46 = vshrl.u32 %v604_v44, 7 }
 0x26f   : > { %v606_v48 = vsub.s32 0, %v605_v46 }
 0x271   : > { %v607_v49 = vrot.slane %v579_v28, %v606_v48 }
 0x273   : > { %v609_v50 = vmul.f32 %v607_v49, %v602_v47 }
 0x275   : > { %610 = vst [vmem:[%s325_s17] sm:$0xff] %v609_v50 }
 0x276 PF: > { %s776_s28 = sshll.u32 %s968_s25, 7  ;;  %s625_s10 = sshll.u32 %s325_s17, 4  ;;  %s626_s10 = int_to_ptr.vmem [resolvable:$true] %s625_s10 }
 0x277   : > { %s623_s24 = scalar_lea.hbm %s1203_s6, %s776_s28  ;;  %s1224_s13 = sand.u32 1, %s956_s22  }
 0x278   : > { %s612_s14 = scalar_lea.sflag [#allocation6], %s1224_s13  ;;  %s888_s16 = scalar_lea.vmem %s626_s10, 128 }
 0x279   : > { %p889_p4 = scmp.ne.s32.totalorder %s626_s10, %s888_s16  ;;  %s986_s18 = smov [#allocation5]  }
 0x27a   : > { %s892_s29 = sshll.u32 %s986_s18, 4  ;;  %s893_s29 = int_to_ptr.vmem [resolvable:$false] %s892_s29 }
 0x27b   : > { %p890_p5 = pnand %p889_p4, %p1071_p3  ;;  %s894_s11 = scalar_lea.vmem %s893_s29, 256 }
 0x27c   : > { %p895_p7 = scmp.lt.s32.totalorder %s626_s10, %s893_s29  ;;  %p896_p8 = scmp.lt.s32.totalorder %s894_s11, %s888_s16 }
 0x27d   : > { %p891_p6 = pneg %p890_p5 }
 0x27e   : > { %p897_p10 = por %p896_p8, %p895_p7 }
 0x280   : > { %p898_p11 = pnand %p897_p10, %p891_p6 }
 0x282   : > { %901 = shalt.err (!%p898_p11)
}
 0x283   : > { %s902_s25 = scalar_lea.hbm %s623_s24, 128  ;;  %s906_s19 = scalar_lea.hbm %s1203_s6, 256 }
 0x284   : > { %p903_p12 = scmp.ne.s32.totalorder %s623_s24, %s902_s25  ;;  %p907_p1 = scmp.lt.s32.totalorder %s623_s24, %s1203_s6 }
 0x285   : > { %p908_p2 = scmp.lt.s32.totalorder %s906_s19, %s902_s25 }
 0x286   : > { %p904_p13 = pnand %p903_p12, %p1071_p3 }
 0x287   : > { %p909_p4 = por %p908_p2, %p907_p1 }
 0x288   : > { %p905_p0 = pneg %p904_p13 }
 0x28a   : > { %p910_p5 = pnand %p909_p4, %p905_p0 }
 0x28c   : > { %913 = shalt.err (!%p910_p5)
}
 0x28d   : > { %805 = dma.vmem_to_hbm [thread:$0]  (%p1071_p3), %s626_s10, 128, %s623_s24, %s612_s14  }
 0x28e PF: > { %s1225_s17 = sld [smem:[#allocation12_spill]] }
 0x28f   : > { %s1226_s21 = sld [smem:[#allocation8_spill]] }
 0x294   : > { %p811_p6 = scmp.ge.s32.totalorder %s1225_s17, 2 }
 0x295   : > { %s637_s23 = sand.u32 1, %s1226_s21  }
 0x296   : > { %p808_p7 = pnand %p811_p6, %p1081_p9  ;;  %s638_s27 = scalar_lea.sflag [#allocation6], %s637_s23 }
 0x298   : > { %p809_p8 = pneg %p808_p7 }
 0x29a   : > { %947 = dma.done.wait (%p809_p8), %s638_s27, 128  }
 0x29b   : > { %949 = vsyncadd (%p809_p8), %s638_s27, 4294967168  ;;  %s19_s28 = sadd.s32 1, %s1225_s17   ;;  %s1228_s7 = sld [smem:[#allocation9_spill]] }
 0x29c   : > { %p16_p10 = scmp.ge.s32.totalorder %s19_s28, 10   ;;  %s1229_s23 = sld [smem:[#allocation16_spill]] }
 0x29d   : > { %s1230_s24 = sld [smem:[#allocation10_spill]]  ;;  %s1234_s21 = smov %s956_s22 }
 0x29e   : > { %s1231_s25 = sld [smem:[#allocation11_spill]]  ;;  %18 = sbr.rel (!%p16_p10) target bundleno = 5 (0x5), region = 106 }
 0x29f   : > { %s1232_s26 = sld [smem:[#allocation13_spill]] }
 0x2a0   : > { %s1233_s27 = sld [smem:[#allocation14_spill]] }
 0x2a1   : > { %s1235_s22 = smov %s1228_s7 }
 0x2a3   :  { %643 = vsyncpa [#allocation6], 1 }
 0x2a4   :  { %645 = vsyncpa [#allocation6 + $0x1], 1 }

</bundles_post_ra>
